<compile_context>
chip_gen: v6e
topology: v6e:2x2x1
jax: 0.10.0
libtpu: 0.0.40
codegen_flags: <defaults>
</compile_context>

<pallas_src>
import math
import functools

import jax
import jax.numpy as jnp
from jax import lax
from jax.experimental import pallas as pl
from jax.experimental.pallas import tpu as pltpu


# --------------------------------------------------------------------------
# helpers (only ops that lower cleanly in Mosaic)
# --------------------------------------------------------------------------
def _erf_f32(x):
    """float32-accurate rational approximation of erf (Eigen/XLA style)."""
    x = jnp.clip(x, -4.0, 4.0)
    x2 = x * x
    p = jnp.float32(-2.72614225801306e-10)
    p = p * x2 + jnp.float32(2.77068142495902e-08)
    p = p * x2 + jnp.float32(-2.10102402082508e-06)
    p = p * x2 + jnp.float32(-5.69250639462346e-05)
    p = p * x2 + jnp.float32(-7.34990630326855e-04)
    p = p * x2 + jnp.float32(-2.95459980854025e-03)
    p = p * x2 + jnp.float32(-1.60960333262415e-02)
    p = p * x
    q = jnp.float32(-1.45660718464996e-05)
    q = q * x2 + jnp.float32(-2.13374055278905e-04)
    q = q * x2 + jnp.float32(-1.68282697438203e-03)
    q = q * x2 + jnp.float32(-7.37332916720468e-03)
    q = q * x2 + jnp.float32(-1.42647390514189e-02)
    return p / q


def _gelu_exact(x):
    # matches torch.nn.GELU() (erf-based, non-approximate)
    return 0.5 * x * (1.0 + _erf_f32(x * jnp.float32(1.0 / math.sqrt(2.0))))


def _mm(a, b):
    # a @ b, f32 accumulation on the MXU
    return lax.dot_general(a, b, (((1,), (0,)), ((), ())),
                           preferred_element_type=jnp.float32)


def _mm_t(a, w):
    # a @ w.T (PyTorch nn.Linear semantics), f32 accumulation
    return lax.dot_general(a, w, (((1,), (1,)), ((), ())),
                           preferred_element_type=jnp.float32)


def _vmem_limit(est_bytes):
    # request roughly the resident footprint (with slack), capped well under
    # the smallest physical VMEM (64 MiB on v7x).
    return int(min(48 * 2 ** 20, max(32 * 2 ** 20, 2 * est_bytes)))


def _pick_row_tile(ns):
    if ns <= 512:
        return ns
    for t in (512, 256, 128, 64, 32, 16, 8):
        if ns % t == 0:
            return t
    return ns


# --------------------------------------------------------------------------
# kernel 1: per-batch attention over the four channel splits
# --------------------------------------------------------------------------
def _attn_kernel(xs_ref, wqkv_ref, bqkv_ref, wo_ref, bo_ref,
                 o_ref, psum_ref, psq_ref,
                 *, seq, e, num_heads):
    dh = e // num_heads
    scale = jnp.float32(1.0 / math.sqrt(dh))
    bf16 = jnp.bfloat16

    # (4, S, E) bf16 block for this batch element -> (4S, E) rows
    x2d = xs_ref[...].reshape(4 * seq, e)

    # fused (folded) q|k|v projection: one bf16 matmul, f32 accumulation
    qkv = _mm(x2d, wqkv_ref[...]) + bqkv_ref[...]          # (4S, 3E) f32
    q = (qkv[:, 0:e] * scale).astype(bf16)
    k = qkv[:, e:2 * e].astype(bf16)
    v = qkv[:, 2 * e:3 * e].astype(bf16)

    head_outs = []
    for h in range(num_heads):                             # Dh is tiny; loop heads
        lo, hi = h * dh, (h + 1) * dh
        qh = q[:, lo:hi].reshape(4, seq, dh)               # splits batched
        kh = k[:, lo:hi].reshape(4, seq, dh)
        vh = v[:, lo:hi].reshape(4, seq, dh)
        s = jnp.einsum('gsd,gtd->gst', qh, kh,
                       preferred_element_type=jnp.float32)  # (4, S, S)
        s = s - jnp.max(s, axis=-1, keepdims=True)
        p = jnp.exp(s)
        p = p * pl.reciprocal(jnp.sum(p, axis=-1, keepdims=True), approx=True)
        oh = jnp.einsum('gst,gtd->gsd', p.astype(bf16), vh,
                        preferred_element_type=jnp.float32)  # (4, S, Dh)
        head_outs.append(oh.reshape(4 * seq, dh))
    o = jnp.concatenate(head_outs, axis=-1)                 # (4S, E) f32
    o = _mm_t(o.astype(bf16), wo_ref[...]) + bo_ref[...]    # MHA out_proj

    # lane-dense (S, C) rows, channels in the original split-major order
    rows = jnp.concatenate([o[i * seq:(i + 1) * seq, :] for i in range(4)],
                           axis=-1)                         # (S, C) f32
    o_ref[...] = rows.astype(o_ref.dtype)
    # single-pass BatchNorm statistics (per-batch partials)
    psum_ref[...] = jnp.sum(rows, axis=0, keepdims=True)
    psq_ref[...] = jnp.sum(rows * rows, axis=0, keepdims=True)


# --------------------------------------------------------------------------
# kernel 2: BN scale/shift + GELU + residual + FFN, over row tiles of (NS, C)
# --------------------------------------------------------------------------
def _ffn_kernel(o_ref, x_ref, scale_ref, shift_ref, w1_ref, w2_ref, out_ref):
    bf16 = jnp.bfloat16
    y = _gelu_exact(o_ref[...] * scale_ref[...] + shift_ref[...]) + x_ref[...]
    h = _mm_t(y.astype(bf16), w1_ref[...])                  # fc1 (no bias)
    out = _mm_t(h.astype(bf16), w2_ref[...]) + y            # fc2(.) + residual
    out_ref[...] = out.astype(out_ref.dtype)


# --------------------------------------------------------------------------
# wrapper
# --------------------------------------------------------------------------
def fine_grained_transformer_layer(x, params, num_heads):
    s, n, c = x.shape
    assert c % 4 == 0
    e = c // 4
    assert e % num_heads == 0
    ns = n * s
    f32, bf16 = jnp.float32, jnp.bfloat16

    # ---- one-time weight prep (XLA side): fold user q/k/v into MHA in-proj and fuse q|k|v
    wqc = params['wiq'] @ params['wq']                      # (E, E)
    wkc = params['wik'] @ params['wk']
    wvc = params['wiv'] @ params['wv']
    wqkv = jnp.concatenate([wqc.T, wkc.T, wvc.T], axis=1).astype(bf16)   # (E, 3E)
    bqkv = jnp.concatenate([params['biq'], params['bik'], params['biv']],
                           axis=1).astype(f32)                            # (1, 3E)
    wo = params['wo'].astype(bf16)
    bo = params['bo'].astype(f32)
    w1 = params['w1'].astype(bf16)
    w2 = params['w2'].astype(bf16)

    # ---- input layouts (XLA side): pre-split for kernel 1, row slab for kernel 2
    xs = jnp.transpose(x.astype(f32).reshape(s, n, 4, e), (1, 2, 0, 3)).astype(bf16)  # (N,4,S,E)
    x_rows = jnp.transpose(x, (1, 0, 2)).reshape(ns, c).astype(f32)                   # (NS, C)

    # ---- kernel 1: attention (grid parallel over batch)
    flops1 = n * (2 * (4 * s) * e * (3 * e) + 16 * s * s * e + 2 * (4 * s) * e * e)
    trans1 = n * 4 * num_heads * s * s
    bytes1 = (n * 4 * s * e) * 2 + (e * 3 * e + e * e) * 2 + (4 * e) * 4 \
             + (n * s * c) * 4 + 2 * (n * c) * 4
    vmem1 = _vmem_limit(2 * (4 * s * e * 2 + s * c * 4 + 2 * c * 4)
                        + (e * 3 * e + e * e) * 2 + (4 * e) * 4
                        + 10 * (4 * s) * (3 * e) * 4
                        + 3 * num_heads * 4 * s * s * 4)

    o_rows, psum, psq = pl.pallas_call(
        functools.partial(_attn_kernel, seq=s, e=e, num_heads=num_heads),
        grid=(n,),
        in_specs=[
            pl.BlockSpec((None, 4, s, e), lambda b: (b, 0, 0, 0)),   # x, per-batch
            pl.BlockSpec((e, 3 * e), lambda b: (0, 0)),              # fused qkv weight
            pl.BlockSpec((1, 3 * e), lambda b: (0, 0)),              # fused qkv bias
            pl.BlockSpec((e, e), lambda b: (0, 0)),                  # out_proj weight
            pl.BlockSpec((1, e), lambda b: (0, 0)),                  # out_proj bias
        ],
        out_specs=(
            pl.BlockSpec((None, s, c), lambda b: (b, 0, 0)),         # attn rows
            pl.BlockSpec((None, 1, c), lambda b: (b, 0, 0)),         # BN sum partial
            pl.BlockSpec((None, 1, c), lambda b: (b, 0, 0)),         # BN sumsq partial
        ),
        out_shape=(
            jax.ShapeDtypeStruct((n, s, c), f32),
            jax.ShapeDtypeStruct((n, 1, c), f32),
            jax.ShapeDtypeStruct((n, 1, c), f32),
        ),
        compiler_params=pltpu.CompilerParams(
            dimension_semantics=("parallel",), vmem_limit_bytes=vmem1),
        cost_estimate=pl.CostEstimate(flops=flops1, transcendentals=trans1,
                                      bytes_accessed=bytes1),
    )(xs, wqkv, bqkv, wo, bo)

    # ---- tiny XLA glue: global BatchNorm1d training-mode statistics (cross-batch
    # coupling cannot live inside the batch-parallel grid), folded into scale/shift.
    cnt = jnp.float32(ns)
    mean = jnp.sum(psum, axis=0) / cnt                              # (1, C)
    var = jnp.maximum(jnp.sum(psq, axis=0) / cnt - mean * mean, 0.0)
    g4 = jnp.tile(params['gamma'], (1, 4))                          # (1, C)
    b4 = jnp.tile(params['beta'], (1, 4))
    bn_scale = (g4 * lax.rsqrt(var + jnp.float32(1e-5))).astype(f32)
    bn_shift = (b4 - mean * bn_scale).astype(f32)

    # ---- kernel 2: BN + GELU + residual + FFN (grid parallel over row tiles)
    tm = _pick_row_tile(ns)
    flops2 = 2 * 2 * ns * c * c
    bytes2 = 3 * ns * c * 4 + 2 * c * c * 2 + 2 * c * 4
    vmem2 = _vmem_limit(2 * (3 * tm * c * 4) + 2 * c * c * 2 + 2 * c * 4
                        + 6 * tm * c * 4)

    out2d = pl.pallas_call(
        _ffn_kernel,
        grid=(ns // tm,),
        in_specs=[
            pl.BlockSpec((tm, c), lambda i: (i, 0)),     # attention rows
            pl.BlockSpec((tm, c), lambda i: (i, 0)),     # residual x rows
            pl.BlockSpec((1, c), lambda i: (0, 0)),      # BN scale
            pl.BlockSpec((1, c), lambda i: (0, 0)),      # BN shift
            pl.BlockSpec((c, c), lambda i: (0, 0)),      # fc1 weight
            pl.BlockSpec((c, c), lambda i: (0, 0)),      # fc2 weight
        ],
        out_specs=pl.BlockSpec((tm, c), lambda i: (i, 0)),
        out_shape=jax.ShapeDtypeStruct((ns, c), f32),
        compiler_params=pltpu.CompilerParams(
            dimension_semantics=("parallel",), vmem_limit_bytes=vmem2),
        cost_estimate=pl.CostEstimate(flops=flops2, transcendentals=ns * c,
                                      bytes_accessed=bytes2),
    )(o_rows.reshape(ns, c), x_rows, bn_scale, bn_shift, w1, w2)

    return jnp.transpose(out2d.reshape(n, s, c), (1, 0, 2))


# --------------------------------------------------------------------------
# deterministic parameter init (shapes from the module's __init__)
# --------------------------------------------------------------------------
def init_params(key, c, num_heads):
    e = c // 4
    ks = jax.random.split(key, 9)

    def lin(k, out_f, in_f):
        bound = 1.0 / math.sqrt(in_f)
        return jax.random.uniform(k, (out_f, in_f), jnp.float32, -bound, bound)

    return dict(
        wq=lin(ks[0], e, e), wk=lin(ks[1], e, e), wv=lin(ks[2], e, e),
        # MHA in_proj (split into q/k/v parts) and out_proj
        wiq=lin(ks[3], e, e), wik=lin(ks[4], e, e), wiv=lin(ks[5], e, e),
        biq=jnp.zeros((1, e), jnp.float32),
        bik=jnp.zeros((1, e), jnp.float32),
        biv=jnp.zeros((1, e), jnp.float32),
        wo=lin(ks[6], e, e),
        bo=jnp.zeros((1, e), jnp.float32),
        # BatchNorm1d(c//4) affine params (PyTorch defaults)
        gamma=jnp.ones((1, e), jnp.float32),
        beta=jnp.zeros((1, e), jnp.float32),
        w1=lin(ks[7], c, c), w2=lin(ks[8], c, c),
    )


# --------------------------------------------------------------------------
# pure-JAX reference (full f32, HIGHEST precision) for correctness check
# --------------------------------------------------------------------------
def reference(x, params, num_heads):
    s, n, c = x.shape
    e = c // 4
    dh = e // num_heads
    hp = lax.Precision.HIGHEST

    def proj(t, w):
        return jnp.einsum('snf,ef->sne', t, w, precision=hp)

    def attn_split(xi):
        q = proj(proj(xi, params['wq']), params['wiq']) + params['biq'][0]
        k = proj(proj(xi, params['wk']), params['wik']) + params['bik'][0]
        v = proj(proj(xi, params['wv']), params['wiv']) + params['biv'][0]
        q = q.reshape(s, n, num_heads, dh)
        k = k.reshape(s, n, num_heads, dh)
        v = v.reshape(s, n, num_heads, dh)
        scores = jnp.einsum('snhd,tnhd->nhst', q, k, precision=hp) / math.sqrt(dh)
        p = jax.nn.softmax(scores, axis=-1)
        o = jnp.einsum('nhst,tnhd->snhd', p, v, precision=hp).reshape(s, n, e)
        o = proj(o, params['wo']) + params['bo'][0]
        mu = jnp.mean(o, axis=(0, 1), keepdims=True)
        var = jnp.mean((o - mu) ** 2, axis=(0, 1), keepdims=True)
        o = (o - mu) / jnp.sqrt(var + 1e-5) * params['gamma'][0] + params['beta'][0]
        o = 0.5 * o * (1.0 + jax.scipy.special.erf(o / math.sqrt(2.0)))
        return o + xi

    parts = [attn_split(x[:, :, i * e:(i + 1) * e]) for i in range(4)]
    y = jnp.concatenate(parts, axis=-1)
    h = jnp.einsum('snc,dc->snd', y, params['w1'], precision=hp)
    return jnp.einsum('snc,dc->snd', h, params['w2'], precision=hp) + y


# --------------------------------------------------------------------------
if __name__ == "__main__":
    c = 32
    num_heads = 2
    # x passed exactly as the PyTorch module would receive it: (2, 8, 32).
    # nn.MultiheadAttention (batch_first=False) attends over dim 0.
    key = jax.random.PRNGKey(0)
    kx, kp = jax.random.split(key)
    x = jax.random.normal(kx, (2, 8, c), jnp.float32)
    params = init_params(kp, c, num_heads)

    out = fine_grained_transformer_layer(x, params, num_heads)
    out = jax.block_until_ready(out)
    assert out.shape == x.shape and out.dtype == jnp.float32

    ref = reference(x, params, num_heads)
    # tolerance sized for bf16 MXU operands (f32 accumulation) vs the f32
    # HIGHEST-precision reference
    if not bool(jnp.allclose(out, ref, atol=3e-2, rtol=3e-2)):
        max_err = float(jnp.max(jnp.abs(out - ref)))
        raise SystemExit(f"mismatch vs reference, max abs err={max_err}")

    print("KERNEL_OK")
</pallas_src>

<mosaic_0001>
module attributes {stable_mosaic.version = 11 : i64} {
  func.func @_attn_kernel(%arg0: i32, %arg1: memref<1x4x2x8xbf16, #tpu.memory_space<vmem>>, %arg2: memref<8x24xbf16, #tpu.memory_space<vmem>>, %arg3: memref<1x24xf32, #tpu.memory_space<vmem>>, %arg4: memref<8x8xbf16, #tpu.memory_space<vmem>>, %arg5: memref<1x8xf32, #tpu.memory_space<vmem>>, %arg6: memref<1x2x32xf32, #tpu.memory_space<vmem>>, %arg7: memref<1x1x32xf32, #tpu.memory_space<vmem>>, %arg8: memref<1x1x32xf32, #tpu.memory_space<vmem>>) attributes {dimension_semantics = [#tpu.dimension_semantics<parallel>], iteration_bounds = array<i64: 8>, scalar_prefetch = 0 : i64, scratch_operands = 0 : i64, tpu.core_type = #tpu.core_type<tc>, window_params = [{transform_indices = @transform_0, window_bounds = array<i64: 1, 4, 2, 8>}, {pipeline_mode = #tpu.pipeline_mode<synchronous>, transform_indices = @transform_1, window_bounds = array<i64: 8, 24>}, {pipeline_mode = #tpu.pipeline_mode<synchronous>, transform_indices = @transform_2, window_bounds = array<i64: 1, 24>}, {pipeline_mode = #tpu.pipeline_mode<synchronous>, transform_indices = @transform_3, window_bounds = array<i64: 8, 8>}, {pipeline_mode = #tpu.pipeline_mode<synchronous>, transform_indices = @transform_4, window_bounds = array<i64: 1, 8>}, {transform_indices = @transform_5, window_bounds = array<i64: 1, 2, 32>}, {transform_indices = @transform_6, window_bounds = array<i64: 1, 1, 32>}, {transform_indices = @transform_7, window_bounds = array<i64: 1, 1, 32>}]} {
    %c0 = arith.constant 0 : index
    %c0_0 = arith.constant 0 : index
    %c0_1 = arith.constant 0 : index
    %c0_2 = arith.constant 0 : index
    %0 = vector.load %arg1[%c0, %c0_0, %c0_1, %c0_2] : memref<1x4x2x8xbf16, #tpu.memory_space<vmem>>, vector<1x4x2x8xbf16>
    %1 = vector.shape_cast %0 : vector<1x4x2x8xbf16> to vector<4x2x8xbf16>
    %2 = vector.shape_cast %1 : vector<4x2x8xbf16> to vector<8x8xbf16>
    %c0_3 = arith.constant 0 : index
    %c0_4 = arith.constant 0 : index
    %3 = vector.load %arg2[%c0_3, %c0_4] : memref<8x24xbf16, #tpu.memory_space<vmem>>, vector<8x24xbf16>
    %cst = arith.constant dense<0.000000e+00> : vector<8x24xf32>
    %4 = tpu.matmul %2, %3, %cst {dimension_numbers = #tpu.dot_dimension_numbers<[1], [0], [0], [1], [0, 0, 1, 1], [], []>} : vector<8x8xbf16>, vector<8x24xbf16>, vector<8x24xf32> -> vector<8x24xf32>
    %c0_5 = arith.constant 0 : index
    %c0_6 = arith.constant 0 : index
    %5 = vector.load %arg3[%c0_5, %c0_6] : memref<1x24xf32, #tpu.memory_space<vmem>>, vector<1x24xf32>
    %6 = vector.broadcast %5 : vector<1x24xf32> to vector<8x24xf32>
    %7 = arith.addf %4, %6 : vector<8x24xf32>
    %8 = vector.extract_strided_slice %7 {offsets = [0, 0], sizes = [8, 8], strides = [1, 1]} : vector<8x24xf32> to vector<8x8xf32>
    %cst_7 = arith.constant 5.000000e-01 : f32
    %9 = vector.broadcast %cst_7 : f32 to vector<8x8xf32>
    %10 = arith.mulf %8, %9 : vector<8x8xf32>
    %11 = arith.truncf %10 : vector<8x8xf32> to vector<8x8xbf16>
    %12 = vector.extract_strided_slice %7 {offsets = [0, 8], sizes = [8, 8], strides = [1, 1]} : vector<8x24xf32> to vector<8x8xf32>
    %13 = arith.truncf %12 : vector<8x8xf32> to vector<8x8xbf16>
    %14 = vector.extract_strided_slice %7 {offsets = [0, 16], sizes = [8, 8], strides = [1, 1]} : vector<8x24xf32> to vector<8x8xf32>
    %15 = arith.truncf %14 : vector<8x8xf32> to vector<8x8xbf16>
    %16 = vector.extract_strided_slice %11 {offsets = [0, 0], sizes = [8, 4], strides = [1, 1]} : vector<8x8xbf16> to vector<8x4xbf16>
    %17 = vector.shape_cast %16 : vector<8x4xbf16> to vector<4x2x4xbf16>
    %18 = vector.extract_strided_slice %13 {offsets = [0, 0], sizes = [8, 4], strides = [1, 1]} : vector<8x8xbf16> to vector<8x4xbf16>
    %19 = vector.shape_cast %18 : vector<8x4xbf16> to vector<4x2x4xbf16>
    %20 = vector.extract_strided_slice %15 {offsets = [0, 0], sizes = [8, 4], strides = [1, 1]} : vector<8x8xbf16> to vector<8x4xbf16>
    %21 = vector.shape_cast %20 : vector<8x4xbf16> to vector<4x2x4xbf16>
    "tpu.trace_start"() <{level = 10 : i32, message = "gsd,gtd->gst"}> : () -> ()
    %cst_8 = arith.constant dense<0.000000e+00> : vector<4x2x2xf32>
    %22 = tpu.matmul %17, %19, %cst_8 {dimension_numbers = #tpu.dot_dimension_numbers<[2], [2], [1], [1], [0, 0, 0, 1, 1, 1], [0], [0]>} : vector<4x2x4xbf16>, vector<4x2x4xbf16>, vector<4x2x2xf32> -> vector<4x2x2xf32>
    "tpu.trace_stop"() : () -> ()
    %cst_9 = arith.constant dense<0xFF800000> : vector<4x2xf32>
    %23 = vector.multi_reduction <maximumf>, %22, %cst_9 [2] : vector<4x2x2xf32> to vector<4x2xf32>
    %24 = vector.shape_cast %23 : vector<4x2xf32> to vector<4x2x1xf32>
    %25 = vector.broadcast %24 : vector<4x2x1xf32> to vector<4x2x2xf32>
    %26 = arith.subf %22, %25 : vector<4x2x2xf32>
    %27 = math.exp %26 : vector<4x2x2xf32>
    %cst_10 = arith.constant dense<0.000000e+00> : vector<4x2xf32>
    %28 = vector.multi_reduction <add>, %27, %cst_10 [2] : vector<4x2x2xf32> to vector<4x2xf32>
    %29 = vector.shape_cast %28 : vector<4x2xf32> to vector<4x2x1xf32>
    %30 = tpu.reciprocal %29 {approx = true} : vector<4x2x1xf32> -> vector<4x2x1xf32>
    %31 = vector.broadcast %30 : vector<4x2x1xf32> to vector<4x2x2xf32>
    %32 = arith.mulf %27, %31 : vector<4x2x2xf32>
    %33 = arith.truncf %32 : vector<4x2x2xf32> to vector<4x2x2xbf16>
    "tpu.trace_start"() <{level = 10 : i32, message = "gst,gtd->gsd"}> : () -> ()
    %cst_11 = arith.constant dense<0.000000e+00> : vector<4x2x4xf32>
    %34 = tpu.matmul %33, %21, %cst_11 {dimension_numbers = #tpu.dot_dimension_numbers<[2], [1], [1], [2], [0, 0, 0, 1, 1, 2], [0], [0]>} : vector<4x2x2xbf16>, vector<4x2x4xbf16>, vector<4x2x4xf32> -> vector<4x2x4xf32>
    "tpu.trace_stop"() : () -> ()
    %35 = vector.shape_cast %34 : vector<4x2x4xf32> to vector<8x4xf32>
    %36 = vector.extract_strided_slice %11 {offsets = [0, 4], sizes = [8, 4], strides = [1, 1]} : vector<8x8xbf16> to vector<8x4xbf16>
    %37 = vector.shape_cast %36 : vector<8x4xbf16> to vector<4x2x4xbf16>
    %38 = vector.extract_strided_slice %13 {offsets = [0, 4], sizes = [8, 4], strides = [1, 1]} : vector<8x8xbf16> to vector<8x4xbf16>
    %39 = vector.shape_cast %38 : vector<8x4xbf16> to vector<4x2x4xbf16>
    %40 = vector.extract_strided_slice %15 {offsets = [0, 4], sizes = [8, 4], strides = [1, 1]} : vector<8x8xbf16> to vector<8x4xbf16>
    %41 = vector.shape_cast %40 : vector<8x4xbf16> to vector<4x2x4xbf16>
    "tpu.trace_start"() <{level = 10 : i32, message = "gsd,gtd->gst"}> : () -> ()
    %cst_12 = arith.constant dense<0.000000e+00> : vector<4x2x2xf32>
    %42 = tpu.matmul %37, %39, %cst_12 {dimension_numbers = #tpu.dot_dimension_numbers<[2], [2], [1], [1], [0, 0, 0, 1, 1, 1], [0], [0]>} : vector<4x2x4xbf16>, vector<4x2x4xbf16>, vector<4x2x2xf32> -> vector<4x2x2xf32>
    "tpu.trace_stop"() : () -> ()
    %cst_13 = arith.constant dense<0xFF800000> : vector<4x2xf32>
    %43 = vector.multi_reduction <maximumf>, %42, %cst_13 [2] : vector<4x2x2xf32> to vector<4x2xf32>
    %44 = vector.shape_cast %43 : vector<4x2xf32> to vector<4x2x1xf32>
    %45 = vector.broadcast %44 : vector<4x2x1xf32> to vector<4x2x2xf32>
    %46 = arith.subf %42, %45 : vector<4x2x2xf32>
    %47 = math.exp %46 : vector<4x2x2xf32>
    %cst_14 = arith.constant dense<0.000000e+00> : vector<4x2xf32>
    %48 = vector.multi_reduction <add>, %47, %cst_14 [2] : vector<4x2x2xf32> to vector<4x2xf32>
    %49 = vector.shape_cast %48 : vector<4x2xf32> to vector<4x2x1xf32>
    %50 = tpu.reciprocal %49 {approx = true} : vector<4x2x1xf32> -> vector<4x2x1xf32>
    %51 = vector.broadcast %50 : vector<4x2x1xf32> to vector<4x2x2xf32>
    %52 = arith.mulf %47, %51 : vector<4x2x2xf32>
    %53 = arith.truncf %52 : vector<4x2x2xf32> to vector<4x2x2xbf16>
    "tpu.trace_start"() <{level = 10 : i32, message = "gst,gtd->gsd"}> : () -> ()
    %cst_15 = arith.constant dense<0.000000e+00> : vector<4x2x4xf32>
    %54 = tpu.matmul %53, %41, %cst_15 {dimension_numbers = #tpu.dot_dimension_numbers<[2], [1], [1], [2], [0, 0, 0, 1, 1, 2], [0], [0]>} : vector<4x2x2xbf16>, vector<4x2x4xbf16>, vector<4x2x4xf32> -> vector<4x2x4xf32>
    "tpu.trace_stop"() : () -> ()
    %55 = vector.shape_cast %54 : vector<4x2x4xf32> to vector<8x4xf32>
    %56 = tpu.concatenate %35, %55 in 1 : vector<8x4xf32>, vector<8x4xf32> -> vector<8x8xf32>
    %57 = arith.truncf %56 : vector<8x8xf32> to vector<8x8xbf16>
    %c0_16 = arith.constant 0 : index
    %c0_17 = arith.constant 0 : index
    %58 = vector.load %arg4[%c0_16, %c0_17] : memref<8x8xbf16, #tpu.memory_space<vmem>>, vector<8x8xbf16>
    %cst_18 = arith.constant dense<0.000000e+00> : vector<8x8xf32>
    %59 = tpu.matmul %57, %58, %cst_18 {dimension_numbers = #tpu.dot_dimension_numbers<[1], [1], [0], [0], [0, 0, 1, 0], [], []>} : vector<8x8xbf16>, vector<8x8xbf16>, vector<8x8xf32> -> vector<8x8xf32>
    %c0_19 = arith.constant 0 : index
    %c0_20 = arith.constant 0 : index
    %60 = vector.load %arg5[%c0_19, %c0_20] : memref<1x8xf32, #tpu.memory_space<vmem>>, vector<1x8xf32>
    %61 = vector.broadcast %60 : vector<1x8xf32> to vector<8x8xf32>
    %62 = arith.addf %59, %61 : vector<8x8xf32>
    %63 = vector.extract_strided_slice %62 {offsets = [0, 0], sizes = [2, 8], strides = [1, 1]} : vector<8x8xf32> to vector<2x8xf32>
    %64 = vector.extract_strided_slice %62 {offsets = [2, 0], sizes = [2, 8], strides = [1, 1]} : vector<8x8xf32> to vector<2x8xf32>
    %65 = vector.extract_strided_slice %62 {offsets = [4, 0], sizes = [2, 8], strides = [1, 1]} : vector<8x8xf32> to vector<2x8xf32>
    %66 = vector.extract_strided_slice %62 {offsets = [6, 0], sizes = [2, 8], strides = [1, 1]} : vector<8x8xf32> to vector<2x8xf32>
    %67 = tpu.concatenate %63, %64, %65, %66 in 1 : vector<2x8xf32>, vector<2x8xf32>, vector<2x8xf32>, vector<2x8xf32> -> vector<2x32xf32>
    %c0_21 = arith.constant 0 : index
    %c0_22 = arith.constant 0 : index
    %c0_23 = arith.constant 0 : index
    %68 = vector.load %arg6[%c0_21, %c0_22, %c0_23] : memref<1x2x32xf32, #tpu.memory_space<vmem>>, vector<1x2x32xf32>
    %69 = vector.shape_cast %68 : vector<1x2x32xf32> to vector<2x32xf32>
    %70 = vector.shape_cast %67 : vector<2x32xf32> to vector<1x2x32xf32>
    tpu.vector_store %arg6[%c0_21, %c0_22, %c0_23], %70 {strides = array<i32>} : memref<1x2x32xf32, #tpu.memory_space<vmem>>, vector<1x2x32xf32>,
    %cst_24 = arith.constant dense<0.000000e+00> : vector<32xf32>
    %71 = vector.multi_reduction <add>, %67, %cst_24 [0] : vector<2x32xf32> to vector<32xf32>
    %72 = vector.shape_cast %71 : vector<32xf32> to vector<1x32xf32>
    %c0_25 = arith.constant 0 : index
    %c0_26 = arith.constant 0 : index
    %c0_27 = arith.constant 0 : index
    %73 = vector.load %arg7[%c0_25, %c0_26, %c0_27] : memref<1x1x32xf32, #tpu.memory_space<vmem>>, vector<1x1x32xf32>
    %74 = vector.shape_cast %73 : vector<1x1x32xf32> to vector<1x32xf32>
    %75 = vector.shape_cast %72 : vector<1x32xf32> to vector<1x1x32xf32>
    tpu.vector_store %arg7[%c0_25, %c0_26, %c0_27], %75 {strides = array<i32>} : memref<1x1x32xf32, #tpu.memory_space<vmem>>, vector<1x1x32xf32>,
    %76 = arith.mulf %67, %67 : vector<2x32xf32>
    %cst_28 = arith.constant dense<0.000000e+00> : vector<32xf32>
    %77 = vector.multi_reduction <add>, %76, %cst_28 [0] : vector<2x32xf32> to vector<32xf32>
    %78 = vector.shape_cast %77 : vector<32xf32> to vector<1x32xf32>
    %c0_29 = arith.constant 0 : index
    %c0_30 = arith.constant 0 : index
    %c0_31 = arith.constant 0 : index
    %79 = vector.load %arg8[%c0_29, %c0_30, %c0_31] : memref<1x1x32xf32, #tpu.memory_space<vmem>>, vector<1x1x32xf32>
    %80 = vector.shape_cast %79 : vector<1x1x32xf32> to vector<1x32xf32>
    %81 = vector.shape_cast %78 : vector<1x32xf32> to vector<1x1x32xf32>
    tpu.vector_store %arg8[%c0_29, %c0_30, %c0_31], %81 {strides = array<i32>} : memref<1x1x32xf32, #tpu.memory_space<vmem>>, vector<1x1x32xf32>,
    return
  }
  func.func @transform_0(%arg0: i32) -> (i32, i32, i32, i32) {
    %c0_i32 = arith.constant 0 : i32
    %c0_i32_0 = arith.constant 0 : i32
    %c0_i32_1 = arith.constant 0 : i32
    %c0_i32_2 = arith.constant 0 : i32
    return %arg0, %c0_i32, %c0_i32_0, %c0_i32_1 : i32, i32, i32, i32
  }
  func.func @transform_1(%arg0: i32) -> (i32, i32) {
    %c0_i32 = arith.constant 0 : i32
    %c0_i32_0 = arith.constant 0 : i32
    %c0_i32_1 = arith.constant 0 : i32
    return %c0_i32, %c0_i32_0 : i32, i32
  }
  func.func @transform_2(%arg0: i32) -> (i32, i32) {
    %c0_i32 = arith.constant 0 : i32
    %c0_i32_0 = arith.constant 0 : i32
    %c0_i32_1 = arith.constant 0 : i32
    return %c0_i32, %c0_i32_0 : i32, i32
  }
  func.func @transform_3(%arg0: i32) -> (i32, i32) {
    %c0_i32 = arith.constant 0 : i32
    %c0_i32_0 = arith.constant 0 : i32
    %c0_i32_1 = arith.constant 0 : i32
    return %c0_i32, %c0_i32_0 : i32, i32
  }
  func.func @transform_4(%arg0: i32) -> (i32, i32) {
    %c0_i32 = arith.constant 0 : i32
    %c0_i32_0 = arith.constant 0 : i32
    %c0_i32_1 = arith.constant 0 : i32
    return %c0_i32, %c0_i32_0 : i32, i32
  }
  func.func @transform_5(%arg0: i32) -> (i32, i32, i32) {
    %c0_i32 = arith.constant 0 : i32
    %c0_i32_0 = arith.constant 0 : i32
    %c0_i32_1 = arith.constant 0 : i32
    return %arg0, %c0_i32, %c0_i32_0 : i32, i32, i32
  }
  func.func @transform_6(%arg0: i32) -> (i32, i32, i32) {
    %c0_i32 = arith.constant 0 : i32
    %c0_i32_0 = arith.constant 0 : i32
    %c0_i32_1 = arith.constant 0 : i32
    return %arg0, %c0_i32, %c0_i32_0 : i32, i32, i32
  }
  func.func @transform_7(%arg0: i32) -> (i32, i32, i32) {
    %c0_i32 = arith.constant 0 : i32
    %c0_i32_0 = arith.constant 0 : i32
    %c0_i32_1 = arith.constant 0 : i32
    return %arg0, %c0_i32, %c0_i32_0 : i32, i32, i32
  }
}

</mosaic_0001>

<bundles_post_ra>
// kernel: tpu_custom_call.1
= control target key start
LH: loop header
LB: loop body
LE: loop exit
PB: predicated region body
PF: predicated region fallthrough
CT: control target
= control target key end

     0   :  { %13 = vsyncpa [#allocation3], 0  ;;  %s2776_s0 = inlined_call_operand.hbm [shape: bf16[8,4,2,8], index: 0, kind: input, shape index: {}]   ;;  %s2777_s1 = inlined_call_operand.hbm [shape: bf16[8,24], index: 1, kind: input, shape index: {}]   ;;  %s2778_s2 = inlined_call_operand.vmem [shape: f32[1,24], index: 2, kind: input, shape index: {}]   ;;  %s2779_s3 = inlined_call_operand.vmem [shape: bf16[8,8], index: 3, kind: input, shape index: {}]   ;;  %s2780_s4 = inlined_call_operand.vmem [shape: f32[1,8], index: 4, kind: input, shape index: {}]   ;;  %s2781_s5 = inlined_call_operand.hbm [shape: f32[8,2,32], index: 5, kind: output, shape index: {0}]   ;;  %s2782_s6 = inlined_call_operand.hbm [shape: f32[8,1,32], index: 6, kind: output, shape index: {1}]   ;;  %s2783_s7 = inlined_call_operand.hbm [shape: f32[8,1,32], index: 7, kind: output, shape index: {2}]  }
   0x1   :  { %15 = vsyncpa [#allocation3 + $0x1], 0 }
   0x2   :  { %16 = vsyncpa [#allocation6], 0 }
   0x3   :  { %17 = vsyncpa [#allocation4], 0 }
   0x4   :  { %19 = vsyncpa [#allocation4 + $0x1], 0 }
   0x5   :  { %20 = vsyncpa [#allocation9], 0 }
   0x6   :  { %22 = vsyncpa [#allocation9 + $0x1], 0  ;;  %s2313_s24 = smov 0   ;;  %s2315_s25 = smov 0  }
   0x7   :  { %s2317_s26 = smov 0   ;;  %s2319_s27 = smov 0  }
   0x8 LB: > { %2790 = sst [smem:[#allocation15_spill]] %s2247_s26  ;;  %s2334_s28 = sadd.s32 4294967295, %s2251_s27   ;;  %s2251_s27 = sphi %s2319_s27, %s2810_s27   ;;  %s2247_s26 = sphi %s2317_s26, %s2807_s26   ;;  %s2243_s25 = sphi %s2315_s25, %s2809_s25   ;;  %s2239_s24 = sphi %s2313_s24, %s2808_s24  }
   0x9   : > { %s2786_s29 = sadd.s32 4294967294, %s2251_s27   ;;  %s2338_s30 = sadd.s32 1, %s2251_s27  }
   0xa   : > { %s35_s8 = sadd.s32 1, %s2247_s26  ;;  %s32_s9 = ssub.s32 %s2251_s27, %s2338_s30 }
   0xb   : > { %p42_p0 = scmp.ne.s32.totalorder %s2247_s26, %s2243_s25  ;;  %p33_p1 = scmp.eq.s32.totalorder %s32_s9, 0 }
   0xc   : > { %p43_p2 = scmp.eq.s32.totalorder %s2251_s27, 0  ;;  %p48_p3 = scmp.ne.s32.totalorder %s2243_s25, %s2239_s24 }
   0xd   : > { %p2785_p4 = scmp.eq.s32.totalorder %s2334_s28, 0  ;;  %p156_p7 = scmp.eq.s32.totalorder %s2334_s28, 7 }
   0xe   : > { %s2350_s10 = scalar_select %p33_p1, %s2247_s26, %s35_s8  }
   0xf   : > { %p2352_p5 = por %p43_p2, %p42_p0  ;;  %p2358_p6 = por %p2785_p4, %p48_p3 }
  0x10   : > { %2791 = sst [smem:[#allocation16_spill]] %s2350_s10  ;;  %p162_p8 = scmp.eq.s32.totalorder %s2786_s29, 7 }
  0x11   : > { %s2793_s12 = scalar_select %p2358_p6, 1, 0 }
  0x12   : > { %p1778_p9 = scmp.ge.s32.totalorder %s2251_s27, 1  ;;  %p221_p10 = scmp.lt.s32.totalorder %s2251_s27, 9 }
  0x13   : > { %p2367_p11 = por %p156_p7, %p42_p0  ;;  %p2371_p12 = por %p162_p8, %p48_p3 }
  0x14   : > { %p2375_p13 = pnand %p1778_p9, %p221_p10  ;;  %s2253_s16 = smov [#allocation5]  }
  0x15   : > { %s2794_s13 = scalar_select %p2367_p11, 1, 0 }
  0x16   : > { %s2795_s14 = scalar_select %p2371_p12, 1, 0 }
  0x17   : > { %s2796_s15 = scalar_select %p2375_p13, 1, 0 }
  0x18   : > { %p1971_p1 = pneg %p2375_p13  ;;  %s234_s17 = sshll.u32 %s2253_s16, 4  ;;  %s235_s17 = int_to_ptr.vmem [resolvable:$true] %s234_s17 }
  0x19   : > { %p1990_p2 = scmp.lt.s32.totalorder %s2251_s27, 8  ;;  %s254_s19 = sand.u32 1, %s2247_s26  }
  0x1a   : > { %p2384_p0 = pnand %p1971_p1, %p2785_p4  ;;  %s1781_s21 = sshll.u32 %s254_s19, 2 }
  0x1b   : > { %p2391_p3 = pnand %p1990_p2, %p2352_p5  ;;  %s2084_s22 = scalar_lea.vmem %s235_s17, 64 }
  0x1c   : > { %p2075_p7 = pneg %p2384_p0  ;;  %p2085_p8 = scmp.ne.s32.totalorder %s235_s17, %s2084_s22 }
  0x1d   : > { %p2092_p12 = scmp.lt.s32.totalorder %s235_s17, %s235_s17  ;;  %p2093_p11 = scmp.lt.s32.totalorder %s2084_s22, %s2084_s22 }
  0x1e   : > { %p2087_p9 = pnand %p2085_p8, %p2075_p7 }
  0x1f   : > { %p2094_p1 = por %p2093_p11, %p2092_p12 }
  0x20   : > { %p2088_p10 = pneg %p2087_p9 }
  0x22   : > { %p2095_p4 = pnand %p2094_p1, %p2088_p10 }
  0x24   : > { %2098 = shalt.err (!%p2095_p4)
}
  0x25   : > { %1974 = dma.hbm_to_vmem [thread:$0]  (!%p2384_p0), %s2777_s1, 64, %s235_s17, [#allocation6]  }
  0x26   : > { %s1814_s9 = sshll.u32 %s2251_s27, 6  ;;  %s258_s11 = scalar_lea.vmem [#allocation2], %s1781_s21 }
  0x27   : > { %s265_s16 = sshll.u32 %s258_s11, 4  ;;  %s2406_s26 = scalar_lea.hbm %s2776_s0, %s1814_s9  ;;  %s2408_s16 = int_to_ptr.vmem [resolvable:$true] %s265_s16 }
  0x28   : > { %s2410_s18 = scalar_lea.sflag [#allocation3], %s254_s19  ;;  %s2099_s22 = scalar_lea.hbm %s2406_s26, 64 }
  0x29   : > { %p2100_p4 = scmp.ne.s32.totalorder %s2406_s26, %s2099_s22  ;;  %p2101_p5 = pneg %p2391_p3 }
  0x2a   : > { %s2104_s23 = scalar_lea.hbm %s2776_s0, 512  ;;  %p2105_p2 = scmp.lt.s32.totalorder %s2406_s26, %s2776_s0 }
  0x2b   : > { %p2102_p11 = pnand %p2101_p5, %p2100_p4  ;;  %p2106_p0 = scmp.lt.s32.totalorder %s2104_s23, %s2099_s22 }
  0x2d   : > { %p2103_p12 = pneg %p2102_p11  ;;  %p2107_p7 = por %p2106_p0, %p2105_p2 }
  0x2f   : > { %p2108_p8 = pnand %p2107_p7, %p2103_p12 }
  0x31   : > { %2111 = shalt.err (!%p2108_p8)
}
  0x32   : > { %s2112_s19 = scalar_lea.vmem %s2408_s16, 64  ;;  %s2254_s8 = smov [#allocation2]  }
  0x33   : > { %p2113_p9 = scmp.ne.s32.totalorder %s2408_s16, %s2112_s19  ;;  %s2117_s9 = sshll.u32 %s2254_s8, 4  ;;  %s2118_s9 = int_to_ptr.vmem [resolvable:$false] %s2117_s9 }
  0x34   : > { %s2119_s11 = scalar_lea.vmem %s2118_s9, 128  ;;  %p2120_p4 = scmp.lt.s32.totalorder %s2408_s16, %s2118_s9 }
  0x35   : > { %p2115_p10 = pnand %p2113_p9, %p2101_p5  ;;  %p2121_p11 = scmp.lt.s32.totalorder %s2119_s11, %s2112_s19 }
  0x37   : > { %p2116_p1 = pneg %p2115_p10  ;;  %p2122_p6 = por %p2121_p11, %p2120_p4 }
  0x39   : > { %p2123_p13 = pnand %p2122_p6, %p2116_p1 }
  0x3b   : > { %2126 = shalt.err (!%p2123_p13)
}
  0x3c   : > { %s2255_s22 = smov 16   ;;  %s2256_s17 = smov 1  }
  0x3d   : > { %1978 = dma.hbm_to_vmem [thread:$0]  (!%p2391_p3), %s2406_s26, 64, %s2408_s16, %s2410_s18, %s2255_s22, %s2255_s22, %s2256_s17  }
  0x3e   : > { %p2799_p5 = scmp.ne.s32.totalorder %s2796_s15, 0 }
  0x3f   : > { %s2434_s21 = sand.u32 (!%p2799_p5), 1, %s2243_s25   ;;  %p2800_p6 = scmp.ne.s32.totalorder (!%p2799_p5), %s2793_s12, 0 }
  0x40   : > { %277 = sbr.rel (%p2799_p5) target bundleno = 2200 (0x898), region = 40  ;;  %s1785_s23 = sshll.u32 (!%p2799_p5), %s2434_s21, 2 }
  0x41   : > { %s280_s29 = scalar_lea.sflag (!%p2799_p5), [#allocation3], %s2434_s21  ;;  %s283_s10 = scalar_lea.vmem (!%p2799_p5), [#allocation2], %s1785_s23 }
  0x45   : > { %2222 = dma.done.wait (%p2800_p6), %s280_s29, 64  }
  0x46   : > { %2224 = vsyncadd (%p2800_p6), %s280_s29, 4294967232  ;;  %p2801_p13 = scmp.eq.s32.totalorder %s2334_s28, 0 }
  0x48   : > { %2226 = dma.done.wait (%p2801_p13), [#allocation6], 64   ;;  %p2802_p3 = pmov %p2801_p13 }
  0x49   : > { %v348_v0 = vlaneseq  ;;  %v2257_v1 = vmov 0.0   ;;  %vm2258_vm0 = vmmov 0   ;;  %v2259_v2 = vmov 1966171168   ;;  %v331_v7 = vld [vmem:[#allocation5] sm:$0xf] }
  0x4a   : > { %2228 = vsyncadd (%p2802_p3), [#allocation6], 4294967232  ;;  %1851 = vmatprep.subr.bf16.mxu0 %v2257_v1  ;;  %1853 = vmatprep.mubr.msk.bf16.mxu0 %vm2258_vm0, %v2257_v1  ;;  %v346_v3 = vunpack.c.l.s4 %v2259_v2  ;;  %vm371_vm1 = vcmask 1043456   ;;  %v327_v8 = vld [vmem:[%s283_s10] sm:$0x1]  ;;  %vm367_vm2 = vcmask 64512  }
  0x4b   : > { %v2449_v4 = vshrl.u32 %v348_v0, 7  ;;  %1857 = vmatprep.subr.bf16.mxu1 %v2257_v1  ;;  %1859 = vmatprep.mubr.msk.bf16.mxu1 %vm2258_vm0, %v2257_v1  ;;  %v328_v9 = vld [vmem:[%s283_s10 + $0x1] sm:$0x1]  ;;  %v373_v10 = vsel %vm371_vm1, %v331_v7, 0  ;;  %v329_v11 = vld [vmem:[%s283_s10 + $0x2] sm:$0x1] }
  0x4c   : > { %v347_v5 = vunpack.c.0.s8 %v346_v3  ;;  %v330_v12 = vld [vmem:[%s283_s10 + $0x3] sm:$0x1]  ;;  %v343_v13 = vcombine.low %v327_v8, %v328_v9  ;;  %1852 = vmatpush3.bf16.msra.mxu0 %v373_v10  ;;  %v1788_v19 = vld [vmem:[%s2778_s2] ss:$0 sm:$0xff]  ;;  %s2260_s15 = smov 120   ;;  %vm484_vm3 = vcmask 31744  }
  0x4d   : > { %v344_v14 = vcombine.low %v329_v11, %v330_v12  ;;  %1863 = vmatprep.subr.bf16.mxu0 %v2257_v1  ;;  %vm717_vm4 = vcmask 9216   ;;  %s2261_s20 = smov 112   ;;  %vm772_vm5 = vcmask 1040384   ;;  %s2262_s16 = smov 116   ;;  %vm768_vm6 = vcmask 15360  }
  0x4e   : > { %v2455_v6 = vsub.s32 %v347_v5, %v2449_v4  ;;  %s2263_s18 = smov 124   ;;  %s2265_s19 = smov 108   ;;  %vm1572_vm7 = vcmask 130048   ;;  %vm1574_vm8 = vcmask 195584   ;;  %vm1576_vm9 = vcmask 254976  }
  0x4f   : > { %s2266_s11 = smov 4   ;;  %s2267_s23 = smov 16  }
  0x50   : > { %v351_v15 = vrot.slane %v343_v13, %v2455_v6  ;;  %v358_v16 = vrot.slane %v344_v14, %v2455_v6  ;;  %s2268_s29 = smov 8   ;;  %s2269_s10 = smov 24  }
  0x51   : > { %s1787_s26 = sshll.u32 %s2434_s21, 1  ;;  %s1809_s12 = sshll.u32 %s2334_s28, 5 }
  0x52   : > { %v359_v17 = vcombine.low %v351_v15, %v358_v16  ;;  %s1597_s8 = scalar_lea.sflag [#allocation4], %s2434_s21  ;;  %p2803_p2 = scmp.ne.s32.totalorder %s2794_s13, 0 }
  0x54   : > { %v366_v18 = vrot.slane %v359_v17, %v2455_v6 }
  0x56   : > { %1854 = vmatmul.mubr.msk.bf16.vlgmr.msra.gmra.mxu0 %vm367_vm2, %v366_v18 }
  0x57   : > { %1865 = vmatprep.mubr.msk.bf16.mxu0 %vm2258_vm0, %v2257_v1 }
 0x116   : > { %v409_v20 = vpop.f32.mrf.mxu0 }
 0x117   : > { %v410_v21 = vadd.f32 %v1788_v19, %v409_v20 }
 0x118   : > { %v1855_v22 = vpop.f32.mrf.mxu0 }
 0x119   : > { %v417_v23 = vpack.c.bf16 %v410_v21, %v410_v21  ;;  %v415_v40 = vmul.f32 0.5, %v410_v21 }
 0x11a   : > { %v412_v24 = vpop.f32.mrf.mxu0 }
 0x11b   : > { %v450_v25 = vrot.slane %v417_v23, %v2455_v6  ;;  %v416_v41 = vpack.c.bf16 %v415_v40, %v415_v40 }
 0x11c   : > { %v1856_v26 = vpop.f32.mrf.mxu0 }
 0x11d   : > { %v451_v27 = vcombine.high %v450_v25, %v450_v25  ;;  %v458_v28 = vrot.slane %v450_v25, %v2455_v6  ;;  %v425_v44 = vrot.slane %v416_v41, %v2455_v6 }
 0x11f   : > { %v465_v29 = vrot.slane %v451_v27, %v2455_v6  ;;  %v466_v30 = vcombine.high %v458_v28, %v458_v28  ;;  %v474_v31 = vrot.slane %v458_v28, %v2455_v6  ;;  %v426_v48 = vcombine.high %v425_v44, %v425_v44 }
 0x120   : > { %v2495_v49 = vrot.slane %v425_v44, %v2455_v6 }
 0x121   : > { %v467_v32 = vcombine.high %v465_v29, %v465_v29  ;;  %v599_v33 = vrot.slane %v466_v30, %v2455_v6  ;;  %v2473_v34 = vrot.slane %v474_v31, %v2455_v6  ;;  %v537_v35 = vrot.slane %v465_v29, %v2455_v6 }
 0x122   : > { %v2504_v52 = vrot.slane %v426_v48, %v2455_v6  ;;  %v2514_v54 = vcombine.high %v2495_v49, %v2495_v49 }
 0x123   : > { %v2477_v36 = vrot.slane %v599_v33, %v2455_v6  ;;  %v661_v37 = vrot.slane %v467_v32, %v2455_v6  ;;  %482 = vrot.lane.b32.xlu0 %v2473_v34, %s2260_s15  ;;  %v2483_v38 = vrot.slane %v537_v35, %v2455_v6 }
 0x124   : > { %v2523_v55 = vcombine.high %v2504_v52, %v2504_v52  ;;  %v1030_v41 = vrot.slane %v2504_v52, %v2455_v6 }
 0x125   : > { %607 = vrot.lane.b32.xlu1 %v2477_v36, %s2260_s15  ;;  %v2486_v39 = vrot.slane %v661_v37, %v2455_v6 }
 0x126   : > { %v1158_v44 = vrot.slane %v2523_v55, %v2455_v6 }
 0x127   : > { %545 = vrot.lane.b32.xlu0 %v2483_v38, %s2260_s15 }
 0x129   : > { %669 = vrot.lane.b32.xlu1 %v2486_v39, %s2260_s15  ;;  %s313_s15 = scalar_lea.vmem [#allocation7], %s1787_s26 }
 0x195   : > { %v483_v42 = vpop.permute.xlu0 %482 }
 0x196   : > { %v489_v43 = vsel %vm484_vm3, %v483_v42, 0  ;;  %v1037_v42 = vrot.slane %v1030_v41, %v2455_v6 }
 0x197   : > { %1858 = vmatpush3.bf16.xpose.msra.mxu1 %v489_v43  ;;  %v608_v45 = vpop.permute.xlu1 %607  ;;  %v966_v43 = vrot.slane %v2495_v49, %v2455_v6 }
 0x198   : > { %1869 = vmatprep.subr.bf16.mxu1 %v2257_v1  ;;  %v613_v50 = vsel %vm484_vm3, %v608_v45, 0 }
 0x199   : > { %v546_v46 = vpop.permute.xlu0 %545  ;;  %v973_v45 = vrot.slane %v966_v43, %v2455_v6 }
 0x19a   : > { %v551_v47 = vsel %vm484_vm3, %v546_v46, 0  ;;  %v1165_v46 = vrot.slane %v1158_v44, %v2455_v6 }
 0x19b   : > { %1864 = vmatpush3.bf16.xpose.msra.mxu0 %v551_v47  ;;  %v670_v51 = vpop.permute.xlu1 %669  ;;  %v1094_v47 = vrot.slane %v2514_v54, %v2455_v6 }
 0x19c   : > { %1875 = vmatprep.subr.bf16.mxu0 %v2257_v1  ;;  %v675_v53 = vsel %vm484_vm3, %v670_v51, 0 }
 0x19d   : > { %v1101_v48 = vrot.slane %v1094_v47, %v2455_v6 }
 0x19e   : > { %1860 = vmatmul.mubr.msk.bf16.vlgmr.msra.gmra.mxu1 %vm484_vm3, %v2495_v49 }
 0x19f   : > { %1870 = vmatpush3.bf16.xpose.msra.mxu1 %v613_v50  ;;  %1871 = vmatprep.mubr.msk.bf16.mxu1 %vm2258_vm0, %v2257_v1 }
 0x1a0   : > { %1881 = vmatprep.subr.bf16.mxu1 %v2257_v1 }
 0x1a2   : > { %1866 = vmatmul.mubr.msk.bf16.vlgmr.msra.gmra.mxu0 %vm484_vm3, %v2504_v52 }
 0x1a3   : > { %1876 = vmatpush3.bf16.xpose.msra.mxu0 %v675_v53  ;;  %1877 = vmatprep.mubr.msk.bf16.mxu0 %vm2258_vm0, %v2257_v1 }
 0x1a4   : > { %1887 = vmatprep.subr.bf16.mxu0 %v2257_v1 }
 0x1a6   : > { %1872 = vmatmul.mubr.msk.bf16.vlgmr.msra.gmra.mxu1 %vm484_vm3, %v2514_v54 }
 0x1a7   : > { %1883 = vmatprep.mubr.msk.bf16.mxu1 %vm2258_vm0, %v2257_v1 }
 0x1aa   : > { %1878 = vmatmul.mubr.msk.bf16.vlgmr.msra.gmra.mxu0 %vm484_vm3, %v2523_v55 }
 0x1ab   : > { %1889 = vmatprep.mubr.msk.bf16.mxu0 %vm2258_vm0, %v2257_v1 }
 0x25e   : > { %v525_v56 = vpop.f32.mrf.mxu1 }
 0x25f   : > { %v718_v57 = vsel %vm717_vm4, %v525_v56, -inf }
 0x260   : > { %719 = vmax.xlane.f32.xlu0 %v718_v57  ;;  %v1861_v58 = vpop.f32.mrf.mxu1 }
 0x262   : > { %v528_v59 = vpop.f32.mrf.mxu1  ;;  %v587_v60 = vpop.f32.mrf.mxu0 }
 0x263   : > { %v721_v61 = vsel %vm717_vm4, %v587_v60, -inf }
 0x264   : > { %v1862_v62 = vpop.f32.mrf.mxu1  ;;  %722 = vmax.xlane.f32.xlu1 %v721_v61  ;;  %v1867_v63 = vpop.f32.mrf.mxu0 }
 0x266   : > { %v590_v0 = vpop.f32.mrf.mxu0  ;;  %v649_v2 = vpop.f32.mrf.mxu1 }
 0x267   : > { %v724_v3 = vsel %vm717_vm4, %v649_v2, -inf }
 0x268   : > { %725 = vmax.xlane.f32.xlu0 %v724_v3  ;;  %v1868_v5 = vpop.f32.mrf.mxu0  ;;  %v1873_v7 = vpop.f32.mrf.mxu1 }
 0x26a   : > { %v652_v8 = vpop.f32.mrf.mxu1  ;;  %v711_v9 = vpop.f32.mrf.mxu0 }
 0x26b   : > { %v727_v10 = vsel %vm717_vm4, %v711_v9, -inf }
 0x26c   : > { %v1874_v11 = vpop.f32.mrf.mxu1  ;;  %728 = vmax.xlane.f32.xlu0 %v727_v10  ;;  %v1879_v12 = vpop.f32.mrf.mxu0 }
 0x26e   : > { %v714_v13 = vpop.f32.mrf.mxu0 }
 0x270   : > { %v1880_v14 = vpop.f32.mrf.mxu0 }
 0x275   : > { %766 = vrot.lane.b32.xlu1 %v2473_v34, %s2261_s20 }
 0x2e9   : > { %v720_v15 = vpop.xlane.xlu0 %719 }
 0x2ea   : > { %v730_v16 = vsub.f32 %v525_v56, %v720_v15 }
 0x2ec   : > { %v734_v17 = vmul.f32 1.442695, %v730_v16 }
 0x2ed   : > { %v723_v18 = vpop.xlane.xlu1 %722 }
 0x2ee   : > { %2041 = vpow2.f32 %v734_v17  ;;  %v731_v19 = vsub.f32 %v587_v60, %v723_v18 }
 0x2f0   : > { %v736_v20 = vmul.f32 1.442695, %v731_v19 }
 0x2f1   : > { %v767_v21 = vpop.permute.xlu1 %766  ;;  %v726_v27 = vpop.xlane.xlu0 %725 }
 0x2f2   : > { %2043 = vpow2.f32 %v736_v20  ;;  %v774_v22 = vsel %vm772_vm5, %v767_v21, 0  ;;  %v732_v29 = vsub.f32 %v649_v2, %v726_v27 }
 0x2f3   : > { %1882 = vmatpush3.bf16.msra.mxu1 %v774_v22 }
 0x2f4   : > { %1893 = vmatprep.subr.bf16.mxu1 %v2257_v1  ;;  %v738_v31 = vmul.f32 1.442695, %v732_v29 }
 0x2f5   : > { %v729_v28 = vpop.xlane.xlu0 %728 }
 0x2f6   : > { %v733_v30 = vsub.f32 %v711_v9, %v729_v28  ;;  %2045 = vpow2.f32 %v738_v31 }
 0x2f8   : > { %v740_v32 = vmul.f32 1.442695, %v733_v30  ;;  %v2264_v30 = vmov 1983009808  }
 0x2f9   : > { %v1463_v31 = vunpack.c.l.s4 %v2264_v30 }
 0x2fa   : > { %2047 = vpow2.f32 %v740_v32 }
 0x2fb   : > { %v2042_v23 = vpop.eup %2041  ;;  %v1464_v32 = vunpack.c.0.s8 %v1463_v31 }
 0x2fc   : > { %v742_v24 = vsel %vm717_vm4, %v2042_v23, 0.0 }
 0x2fd   : > { %743 = vadd.xlane.f32.xlu1 %v742_v24 }
 0x2ff   : > { %v2044_v25 = vpop.eup %2043 }
 0x300   : > { %v745_v26 = vsel %vm717_vm4, %v2044_v25, 0.0 }
 0x301   : > { %746 = vadd.xlane.f32.xlu0 %v745_v26 }
 0x303   : > { %v2046_v33 = vpop.eup %2045 }
 0x304   : > { %v748_v37 = vsel %vm717_vm4, %v2046_v33, 0.0 }
 0x307   : > { %v2048_v35 = vpop.eup %2047 }
 0x308   : > { %v751_v40 = vsel %vm717_vm4, %v2048_v35, 0.0 }
 0x30e   : > { %864 = vrot.lane.b32.xlu1 %v2477_v36, %s2261_s20 }
 0x312   : > { %912 = vrot.lane.b32.xlu1 %v2486_v39, %s2261_s20 }
 0x317   : > { %816 = vrot.lane.b32.xlu0 %v2483_v38, %s2261_s20  ;;  %s1618_s20 = sshll.u32 %s313_s15, 4  ;;  %s2663_s20 = int_to_ptr.vmem [resolvable:$true] %s1618_s20 }
 0x318   : > { %s2127_s9 = scalar_lea.vmem %s2663_s20, 32 }
 0x319   : > { %p2128_p12 = scmp.ne.s32.totalorder %s2663_s20, %s2127_s9 }
 0x31b   : > { %p2129_p0 = pnand %p2128_p12, %p2803_p2 }
 0x31d   : > { %p2130_p7 = pneg %p2129_p0 }
 0x336   : > { %749 = vadd.xlane.f32.xlu1 %v748_v37  ;;  %752 = vadd.xlane.f32.xlu0 %v751_v40 }
 0x347   : > { %1040 = vrot.lane.b32.xlu1 %v2483_v38, %s2262_s16 }
 0x34b   : > { %1038 = vrot.lane.b32.xlu1 %v1037_v42, %s2263_s18 }
 0x34c   : > { %976 = vrot.lane.b32.xlu0 %v2473_v34, %s2262_s16 }
 0x34f   : > { %1168 = vrot.lane.b32.xlu1 %v2486_v39, %s2262_s16 }
 0x350   : > { %974 = vrot.lane.b32.xlu0 %v973_v45, %s2263_s18 }
 0x353   : > { %1166 = vrot.lane.b32.xlu1 %v1165_v46, %s2263_s18 }
 0x354   : > { %1104 = vrot.lane.b32.xlu0 %v2477_v36, %s2262_s16 }
 0x358   : > { %1102 = vrot.lane.b32.xlu0 %v1101_v48, %s2263_s18 }
 0x386   : > { %v744_v49 = vpop.xlane.xlu1 %743 }
 0x387   : > { %2049 = vrcp.f32 %v744_v49 }
 0x38a   : > { %v747_v50 = vpop.xlane.xlu0 %746  ;;  %v865_v55 = vpop.permute.xlu1 %864 }
 0x38b   : > { %2051 = vrcp.f32 %v747_v50  ;;  %v870_v58 = vsel %vm772_vm5, %v865_v55, 0 }
 0x38e   : > { %v817_v51 = vpop.permute.xlu0 %816  ;;  %v913_v59 = vpop.permute.xlu1 %912 }
 0x38f   : > { %v822_v52 = vsel %vm772_vm5, %v817_v51, 0  ;;  %v918_v61 = vsel %vm772_vm5, %v913_v59, 0 }
 0x390   : > { %1888 = vmatpush3.bf16.msra.mxu0 %v822_v52 }
 0x391   : > { %1899 = vmatprep.subr.bf16.mxu0 %v2257_v1 }
 0x394   : > { %v2050_v53 = vpop.eup %2049 }
 0x395   : > { %v758_v56 = vmul.f32 %v2050_v53, %v2042_v23 }
 0x397   : > { %v762_v54 = vpack.c.bf16 %v758_v56, %v758_v56 }
 0x398   : > { %v2052_v57 = vpop.eup %2051 }
 0x399   : > { %1884 = vmatmul.mubr.msk.bf16.vlgmr.msra.gmra.mxu1 %vm768_vm6, %v762_v54  ;;  %v759_v6 = vmul.f32 %v2052_v57, %v2044_v25 }
 0x39a   : > { %1894 = vmatpush3.bf16.msra.mxu1 %v870_v58  ;;  %1895 = vmatprep.mubr.msk.bf16.mxu1 %vm2258_vm0, %v2257_v1 }
 0x39b   : > { %v763_v60 = vpack.c.bf16 %v759_v6, %v759_v6  ;;  %1905 = vmatprep.subr.bf16.mxu1 %v2257_v1 }
 0x39d   : > { %1890 = vmatmul.mubr.msk.bf16.vlgmr.msra.gmra.mxu0 %vm768_vm6, %v763_v60 }
 0x39e   : > { %1900 = vmatpush3.bf16.msra.mxu0 %v918_v61  ;;  %1901 = vmatprep.mubr.msk.bf16.mxu0 %vm2258_vm0, %v2257_v1 }
 0x39f   : > { %1911 = vmatprep.subr.bf16.mxu0 %v2257_v1 }
 0x3bf   : > { %v750_v62 = vpop.xlane.xlu1 %749  ;;  %v753_v63 = vpop.xlane.xlu0 %752 }
 0x3c0   : > { %2053 = vrcp.f32 %v750_v62 }
 0x3c1   : > { %2055 = vrcp.f32 %v753_v63 }
 0x3c3   : > { %v977_v0 = vpop.permute.xlu0 %976  ;;  %v1041_v2 = vpop.permute.xlu1 %1040 }
 0x3c4   : > { %v982_v12 = vsel %vm484_vm3, %v977_v0, 0  ;;  %v1046_v14 = vsel %vm484_vm3, %v1041_v2, 0 }
 0x3c7   : > { %v975_v10 = vpop.permute.xlu0 %974  ;;  %v1039_v13 = vpop.permute.xlu1 %1038 }
 0x3cb   : > { %v1105_v15 = vpop.permute.xlu0 %1104  ;;  %v1169_v16 = vpop.permute.xlu1 %1168 }
 0x3cc   : > { %v1110_v17 = vsel %vm484_vm3, %v1105_v15, 0  ;;  %v1174_v18 = vsel %vm484_vm3, %v1169_v16, 0 }
 0x3cd   : > { %v2054_v3 = vpop.eup %2053 }
 0x3ce   : > { %v2056_v5 = vpop.eup %2055  ;;  %v760_v7 = vmul.f32 %v2054_v3, %v2046_v33  ;;  %v2598_v33 = vsub.s32 %v1464_v32, %v2449_v4 }
 0x3cf   : > { %v761_v8 = vmul.f32 %v2056_v5, %v2048_v35  ;;  %v1103_v19 = vpop.permute.xlu0 %1102  ;;  %v1167_v20 = vpop.permute.xlu1 %1166 }
 0x3d0   : > { %v764_v9 = vpack.c.bf16 %v760_v7, %v760_v7 }
 0x3d1   : > { %v765_v11 = vpack.c.bf16 %v761_v8, %v761_v8 }
 0x3d2   : > { %1896 = vmatmul.mubr.msk.bf16.vlgmr.msra.gmra.mxu1 %vm768_vm6, %v764_v9 }
 0x3d3   : > { %1902 = vmatmul.mubr.msk.bf16.vlgmr.msra.gmra.mxu0 %vm768_vm6, %v765_v11  ;;  %1906 = vmatpush3.bf16.xpose.msra.mxu1 %v982_v12 }
 0x3d4   : > { %1912 = vmatpush3.bf16.xpose.msra.mxu0 %v1046_v14  ;;  %1907 = vmatprep.mubr.msk.bf16.mxu1 %vm2258_vm0, %v2257_v1 }
 0x3d5   : > { %1913 = vmatprep.mubr.msk.bf16.mxu0 %vm2258_vm0, %v2257_v1  ;;  %1917 = vmatprep.subr.bf16.mxu1 %v2257_v1 }
 0x3d6   : > { %1923 = vmatprep.subr.bf16.mxu0 %v2257_v1 }
 0x3da   : > { %1908 = vmatmul.mubr.msk.bf16.vlgmr.msra.gmra.mxu1 %vm484_vm3, %v975_v10 }
 0x3db   : > { %1914 = vmatmul.mubr.msk.bf16.vlgmr.msra.gmra.mxu0 %vm484_vm3, %v1039_v13  ;;  %1918 = vmatpush3.bf16.xpose.msra.mxu1 %v1110_v17 }
 0x3dc   : > { %1924 = vmatpush3.bf16.xpose.msra.mxu0 %v1174_v18  ;;  %1919 = vmatprep.mubr.msk.bf16.mxu1 %vm2258_vm0, %v2257_v1 }
 0x3dd   : > { %1925 = vmatprep.mubr.msk.bf16.mxu0 %vm2258_vm0, %v2257_v1  ;;  %1929 = vmatprep.subr.bf16.mxu1 %v2257_v1 }
 0x3de   : > { %1935 = vmatprep.subr.bf16.mxu0 %v2257_v1 }
 0x3e2   : > { %1920 = vmatmul.mubr.msk.bf16.vlgmr.msra.gmra.mxu1 %vm484_vm3, %v1103_v19 }
 0x3e3   : > { %1926 = vmatmul.mubr.msk.bf16.vlgmr.msra.gmra.mxu0 %vm484_vm3, %v1167_v20  ;;  %1931 = vmatprep.mubr.msk.bf16.mxu1 %vm2258_vm0, %v2257_v1 }
 0x3e4   : > { %1937 = vmatprep.mubr.msk.bf16.mxu0 %vm2258_vm0, %v2257_v1 }
 0x459   : > { %v810_v21 = vpop.f32.mrf.mxu1 }
 0x45b   : > { %v1885_v22 = vpop.f32.mrf.mxu1 }
 0x45d   : > { %v813_v23 = vpop.f32.mrf.mxu1  ;;  %v858_v24 = vpop.f32.mrf.mxu0 }
 0x45e   : > { %v1460_v25 = vcombine.low %v810_v21, %v858_v24 }
 0x45f   : > { %v1886_v26 = vpop.f32.mrf.mxu1  ;;  %v1891_v27 = vpop.f32.mrf.mxu0 }
 0x460   : > { %v2601_v43 = vrot.slane %v1460_v25, %v2598_v33 }
 0x461   : > { %v861_v28 = vpop.f32.mrf.mxu0 }
 0x463   : > { %v1892_v29 = vpop.f32.mrf.mxu0 }
 0x492   : > { %v906_v35 = vpop.f32.mrf.mxu1 }
 0x493   : > { %v954_v37 = vpop.f32.mrf.mxu0 }
 0x494   : > { %v1461_v40 = vcombine.low %v906_v35, %v954_v37  ;;  %v1897_v41 = vpop.f32.mrf.mxu1 }
 0x495   : > { %v1903_v42 = vpop.f32.mrf.mxu0 }
 0x496   : > { %v2604_v44 = vrot.slane %v1461_v40, %v2598_v33  ;;  %v909_v45 = vpop.f32.mrf.mxu1 }
 0x497   : > { %v957_v46 = vpop.f32.mrf.mxu0 }
 0x498   : > { %v1476_v47 = vcombine.low %v2601_v43, %v2604_v44  ;;  %v1898_v48 = vpop.f32.mrf.mxu1 }
 0x499   : > { %v1904_v49 = vpop.f32.mrf.mxu0 }
 0x49a   : > { %v1018_v4 = vpop.f32.mrf.mxu1 }
 0x49b   : > { %v1082_v50 = vpop.f32.mrf.mxu0  ;;  %v1216_v51 = vsel %vm717_vm4, %v1018_v4, -inf }
 0x49c   : > { %1217 = vmax.xlane.f32.xlu0 %v1216_v51  ;;  %v1909_v52 = vpop.f32.mrf.mxu1  ;;  %v1219_v53 = vsel %vm717_vm4, %v1082_v50, -inf }
 0x49d   : > { %1220 = vmax.xlane.f32.xlu1 %v1219_v53  ;;  %v1915_v55 = vpop.f32.mrf.mxu0 }
 0x49e   : > { %v1021_v56 = vpop.f32.mrf.mxu1  ;;  %v1504_v55 = vld [vmem:[%s2779_s3] sm:$0xf] }
 0x49f   : > { %v1085_v54 = vpop.f32.mrf.mxu0  ;;  %v1516_v56 = vsel %vm367_vm2, %v1504_v55, 0 }
 0x4a0   : > { %v1910_v57 = vpop.f32.mrf.mxu1 }
 0x4a1   : > { %v1916_v58 = vpop.f32.mrf.mxu0 }
 0x4a2   : > { %v1146_v6 = vpop.f32.mrf.mxu1 }
 0x4a3   : > { %v1210_v59 = vpop.f32.mrf.mxu0  ;;  %v1222_v60 = vsel %vm717_vm4, %v1146_v6, -inf }
 0x4a4   : > { %1223 = vmax.xlane.f32.xlu0 %v1222_v60  ;;  %v1921_v61 = vpop.f32.mrf.mxu1  ;;  %v1225_v2 = vsel %vm717_vm4, %v1210_v59, -inf }
 0x4a5   : > { %v1927_v62 = vpop.f32.mrf.mxu0 }
 0x4a6   : > { %v1149_v63 = vpop.f32.mrf.mxu1 }
 0x4a7   : > { %v1213_v0 = vpop.f32.mrf.mxu0 }
 0x4a8   : > { %v1922_v3 = vpop.f32.mrf.mxu1  ;;  %1226 = vmax.xlane.f32.xlu0 %v1225_v2 }
 0x4a9   : > { %v1928_v5 = vpop.f32.mrf.mxu0 }
 0x4ae   : > { %1264 = vrot.lane.b32.xlu1 %v2473_v34, %s2265_s19 }
 0x525   : > { %v1218_v7 = vpop.xlane.xlu0 %1217 }
 0x526   : > { %v1228_v8 = vsub.f32 %v1018_v4, %v1218_v7  ;;  %v1221_v9 = vpop.xlane.xlu1 %1220 }
 0x527   : > { %v1229_v10 = vsub.f32 %v1082_v50, %v1221_v9 }
 0x528   : > { %v1232_v11 = vmul.f32 1.442695, %v1228_v8 }
 0x529   : > { %v1234_v12 = vmul.f32 1.442695, %v1229_v10 }
 0x52a   : > { %2057 = vpow2.f32 %v1232_v11  ;;  %v1265_v13 = vpop.permute.xlu1 %1264 }
 0x52b   : > { %2059 = vpow2.f32 %v1234_v12  ;;  %v1270_v14 = vsel %vm772_vm5, %v1265_v13, 0 }
 0x52c   : > { %1930 = vmatpush3.bf16.msra.mxu1 %v1270_v14 }
 0x52d   : > { %v1224_v15 = vpop.xlane.xlu0 %1223  ;;  %1941 = vmatprep.subr.bf16.mxu1 %v2257_v1 }
 0x52e   : > { %v1230_v16 = vsub.f32 %v1146_v6, %v1224_v15 }
 0x530   : > { %v1236_v17 = vmul.f32 1.442695, %v1230_v16 }
 0x531   : > { %v1227_v18 = vpop.xlane.xlu0 %1226 }
 0x532   : > { %2061 = vpow2.f32 %v1236_v17  ;;  %v1231_v34 = vsub.f32 %v1210_v59, %v1227_v18  ;;  %v1806_v17 = vld [vmem:[%s2780_s4] ss:$0 sm:$0xff] }
 0x534   : > { %v1238_v19 = vmul.f32 1.442695, %v1231_v34 }
 0x536   : > { %2063 = vpow2.f32 %v1238_v19 }
 0x537   : > { %v2058_v20 = vpop.eup %2057 }
 0x538   : > { %v2060_v21 = vpop.eup %2059  ;;  %v1240_v22 = vsel %vm717_vm4, %v2058_v20, 0.0 }
 0x539   : > { %1241 = vadd.xlane.f32.xlu1 %v1240_v22  ;;  %v1243_v23 = vsel %vm717_vm4, %v2060_v21, 0.0 }
 0x53a   : > { %1244 = vadd.xlane.f32.xlu0 %v1243_v23 }
 0x53f   : > { %v2062_v24 = vpop.eup %2061 }
 0x540   : > { %v1246_v25 = vsel %vm717_vm4, %v2062_v24, 0.0 }
 0x541   : > { %1247 = vadd.xlane.f32.xlu1 %v1246_v25 }
 0x543   : > { %v2064_v26 = vpop.eup %2063 }
 0x544   : > { %v1249_v27 = vsel %vm717_vm4, %v2064_v26, 0.0 }
 0x545   : > { %1250 = vadd.xlane.f32.xlu0 %v1249_v27 }
 0x552   : > { %1360 = vrot.lane.b32.xlu1 %v2477_v36, %s2265_s19 }
 0x556   : > { %1408 = vrot.lane.b32.xlu1 %v2486_v39, %s2265_s19 }
 0x55b   : > { %1312 = vrot.lane.b32.xlu0 %v2483_v38, %s2265_s19  ;;  %s2661_s19 = scalar_lea.hbm %s2781_s5, %s1809_s12 }
 0x5c2   : > { %v1242_v28 = vpop.xlane.xlu1 %1241 }
 0x5c3   : > { %2065 = vrcp.f32 %v1242_v28  ;;  %v1245_v29 = vpop.xlane.xlu0 %1244 }
 0x5c4   : > { %2067 = vrcp.f32 %v1245_v29 }
 0x5ca   : > { %v1248_v30 = vpop.xlane.xlu1 %1247 }
 0x5cb   : > { %2069 = vrcp.f32 %v1248_v30 }
 0x5ce   : > { %v1361_v31 = vpop.permute.xlu1 %1360  ;;  %v1251_v32 = vpop.xlane.xlu0 %1250 }
 0x5cf   : > { %2071 = vrcp.f32 %v1251_v32  ;;  %v1366_v38 = vsel %vm772_vm5, %v1361_v31, 0 }
 0x5d0   : > { %v2066_v35 = vpop.eup %2065 }
 0x5d1   : > { %v2068_v37 = vpop.eup %2067  ;;  %v1256_v40 = vmul.f32 %v2066_v35, %v2058_v20 }
 0x5d2   : > { %v1313_v41 = vpop.permute.xlu0 %1312  ;;  %v1257_v36 = vmul.f32 %v2068_v37, %v2060_v21  ;;  %v1409_v45 = vpop.permute.xlu1 %1408 }
 0x5d3   : > { %v1318_v42 = vsel %vm772_vm5, %v1313_v41, 0  ;;  %v1260_v39 = vpack.c.bf16 %v1256_v40, %v1256_v40  ;;  %v1414_v48 = vsel %vm772_vm5, %v1409_v45, 0 }
 0x5d4   : > { %1936 = vmatpush3.bf16.msra.mxu0 %v1318_v42  ;;  %v1261_v46 = vpack.c.bf16 %v1257_v36, %v1257_v36 }
 0x5d5   : > { %1932 = vmatmul.mubr.msk.bf16.vlgmr.msra.gmra.mxu1 %vm768_vm6, %v1260_v39  ;;  %1947 = vmatprep.subr.bf16.mxu0 %v2257_v1 }
 0x5d6   : > { %1942 = vmatpush3.bf16.msra.mxu1 %v1366_v38  ;;  %1943 = vmatprep.mubr.msk.bf16.mxu1 %vm2258_vm0, %v2257_v1 }
 0x5d7   : > { %1938 = vmatmul.mubr.msk.bf16.vlgmr.msra.gmra.mxu0 %vm768_vm6, %v1261_v46  ;;  %1953 = vmatprep.subr.bf16.mxu1 %v2257_v1 }
 0x5d8   : > { %v2070_v49 = vpop.eup %2069  ;;  %1948 = vmatpush3.bf16.msra.mxu0 %v1414_v48  ;;  %1949 = vmatprep.mubr.msk.bf16.mxu0 %vm2258_vm0, %v2257_v1 }
 0x5d9   : > { %v1258_v4 = vmul.f32 %v2070_v49, %v2062_v24 }
 0x5db   : > { %v1262_v50 = vpack.c.bf16 %v1258_v4, %v1258_v4 }
 0x5dc   : > { %v2072_v51 = vpop.eup %2071 }
 0x5dd   : > { %1944 = vmatmul.mubr.msk.bf16.vlgmr.msra.gmra.mxu1 %vm768_vm6, %v1262_v50  ;;  %v1259_v52 = vmul.f32 %v2072_v51, %v2064_v26 }
 0x5de   : > { %1955 = vmatprep.mubr.msk.bf16.mxu1 %vm2258_vm0, %v2257_v1  ;;  %1954 = vmatpush3.bf16.xpose.msra.mxu1 %v1516_v56 }
 0x5df   : > { %v1263_v53 = vpack.c.bf16 %v1259_v52, %v1259_v52 }
 0x5e1   : > { %1950 = vmatmul.mubr.msk.bf16.vlgmr.msra.gmra.mxu0 %vm768_vm6, %v1263_v53 }
 0x695   : > { %v1306_v54 = vpop.f32.mrf.mxu1 }
 0x697   : > { %v1933_v57 = vpop.f32.mrf.mxu1  ;;  %v1354_v58 = vpop.f32.mrf.mxu0 }
 0x698   : > { %v1482_v0 = vcombine.low %v1306_v54, %v1354_v58 }
 0x699   : > { %v1309_v6 = vpop.f32.mrf.mxu1  ;;  %v1939_v59 = vpop.f32.mrf.mxu0 }
 0x69a   : > { %v1490_v9 = vrot.slane %v1482_v0, %v2598_v33 }
 0x69b   : > { %v1934_v60 = vpop.f32.mrf.mxu1  ;;  %v1357_v61 = vpop.f32.mrf.mxu0 }
 0x69d   : > { %v1940_v62 = vpop.f32.mrf.mxu0  ;;  %v1402_v63 = vpop.f32.mrf.mxu1 }
 0x69f   : > { %v1945_v1 = vpop.f32.mrf.mxu1 }
 0x6a1   : > { %v1405_v2 = vpop.f32.mrf.mxu1  ;;  %v1450_v3 = vpop.f32.mrf.mxu0 }
 0x6a2   : > { %v1483_v5 = vcombine.low %v1402_v63, %v1450_v3 }
 0x6a3   : > { %v1946_v7 = vpop.f32.mrf.mxu1  ;;  %v1951_v8 = vpop.f32.mrf.mxu0 }
 0x6a4   : > { %v1497_v10 = vrot.slane %v1483_v5, %v2598_v33 }
 0x6a5   : > { %v1453_v11 = vpop.f32.mrf.mxu0 }
 0x6a6   : > { %v1498_v12 = vcombine.low %v1490_v9, %v1497_v10 }
 0x6a7   : > { %v1952_v13 = vpop.f32.mrf.mxu0 }
 0x6a8   : > { %1499 = vrot.lane.b32.xlu0 %v1498_v12, %s2266_s11  ;;  %s2270_s11 = smov [#allocation7]  }
 0x6a9   : > { %s2131_s22 = sshll.u32 %s2270_s11, 4  ;;  %s2132_s22 = int_to_ptr.vmem [resolvable:$false] %s2131_s22 }
 0x6aa   : > { %s2133_s17 = scalar_lea.vmem %s2132_s22, 64  ;;  %p2134_p8 = scmp.lt.s32.totalorder %s2663_s20, %s2132_s22 }
 0x6ab   : > { %p2135_p9 = scmp.lt.s32.totalorder %s2133_s17, %s2127_s9 }
 0x6ad   : > { %p2136_p10 = por %p2135_p9, %p2134_p8 }
 0x6af   : > { %p2137_p1 = pnand %p2136_p10, %p2130_p7 }
 0x71a   : > { %v1500_v14 = vpop.permute.xlu0 %1499 }
 0x71b   : > { %v1502_v15 = vsel %vm484_vm3, %v1476_v47, %v1500_v14 }
 0x71c   : > { %v1503_v16 = vpack.c.bf16 %v1502_v15, %v1502_v15 }
 0x71e   : > { %1956 = vmatmul.mubr.msk.bf16.vlgmr.msra.gmra.mxu1 %vm367_vm2, %v1503_v16 }
 0x7de   : > { %v1552_v33 = vpop.f32.mrf.mxu1 }
 0x7df   : > { %v1553_v18 = vadd.f32 %v1806_v17, %v1552_v33 }
 0x7e0   : > { %v1957_v34 = vpop.f32.mrf.mxu1 }
 0x7e1   : > { %v1563_v19 = vrot.slane %v1553_v18, 4  ;;  %v1559_v20 = vrot.slane %v1553_v18, 2  ;;  %v1567_v44 = vrot.slane %v1553_v18, 6 }
 0x7e2   : > { %v1555_v21 = vpop.f32.mrf.mxu1 }
 0x7e3   : > { %1564 = vrot.lane.b32.xlu0 %v1563_v19, %s2267_s23  ;;  %1560 = vrot.lane.b32.xlu1 %v1559_v20, %s2268_s29 }
 0x7e4   : > { %v1958_v43 = vpop.f32.mrf.mxu1 }
 0x7e7   : > { %1568 = vrot.lane.b32.xlu1 %v1567_v44, %s2269_s10 }
 0x855   : > { %v1561_v47 = vpop.permute.xlu1 %1560  ;;  %v1565_v22 = vpop.permute.xlu0 %1564 }
 0x856   : > { %v1571_v23 = vsel %vm367_vm2, %v1553_v18, %v1561_v47 }
 0x857   : > { %v1573_v24 = vsel %vm1572_vm7, %v1571_v23, %v1565_v22 }
 0x859   : > { %v1569_v25 = vpop.permute.xlu1 %1568 }
 0x85a   : > { %v1575_v26 = vsel %vm1574_vm8, %v1573_v24, %v1569_v25 }
 0x85b   : > { %v1578_v27 = vsel %vm1576_vm9, %v1575_v26, 0.0  ;;  %v1587_v28 = vmul.f32 %v1575_v26, %v1575_v26  ;;  %1577 = vst.msk [vmem:[%s313_s15] sm:$0x3] %vm1576_vm9, %v1575_v26 }
 0x85c   : > { %v1579_v29 = vrot.slane %v1578_v27, 4 }
 0x85d   : > { %2140 = shalt.err (!%p2137_p1)
}
 0x85e   : > { %s2141_s23 = scalar_lea.hbm %s2661_s19, 32  ;;  %s2145_s26 = scalar_lea.hbm %s2781_s5, 256 }
 0x85f   : > { %p2142_p4 = scmp.ne.s32.totalorder %s2661_s19, %s2141_s23  ;;  %p2146_p6 = scmp.lt.s32.totalorder %s2661_s19, %s2781_s5 }
 0x860   : > { %p2147_p13 = scmp.lt.s32.totalorder %s2145_s26, %s2141_s23 }
 0x861   : > { %p2143_p11 = pnand %p2142_p4, %p2803_p2 }
 0x862   : > { %p2148_p3 = por %p2147_p13, %p2146_p6 }
 0x863   : > { %p2144_p5 = pneg %p2143_p11 }
 0x865   : > { %p2149_p12 = pnand %p2148_p3, %p2144_p5 }
 0x867   : > { %2152 = shalt.err (!%p2149_p12)
}
 0x868   : > { %1965 = dma.vmem_to_hbm [thread:$0]  (%p2803_p2), %s2663_s20, 32, %s2661_s19, %s1597_s8   ;;  %v1588_v30 = vsel %vm1576_vm9, %v1587_v28, 0.0  ;;  %v1580_v31 = vadd.f32 %v1579_v29, %v1578_v27  ;;  %vm1585_vm10 = vcmask 253952  }
 0x869   : > { %v1589_v32 = vrot.slane %v1588_v30, 4  ;;  %s1601_s16 = sand.u32 1, %s2334_s28   ;;  %s1810_s18 = sshll.u32 %s2334_s28, 4 }
 0x86a   : > { %v1581_v35 = vrot.slane %v1580_v31, 2  ;;  %s319_s9 = scalar_lea.vmem [#allocation8], %s2434_s21  ;;  %s325_s22 = scalar_lea.vmem [#allocation10], %s2434_s21 }
 0x86b   : > { %v1590_v37 = vadd.f32 %v1589_v32, %v1588_v30  ;;  %s1631_s11 = sshll.u32 %s319_s9, 4  ;;  %s1644_s20 = sshll.u32 %s325_s22, 4  ;;  %s2700_s11 = int_to_ptr.vmem [resolvable:$true] %s1631_s11  ;;  %s2708_s20 = int_to_ptr.vmem [resolvable:$true] %s1644_s20 }
 0x86c   : > { %v1582_v40 = vadd.f32 %v1581_v35, %v1580_v31  ;;  %s2698_s17 = scalar_lea.hbm %s2782_s6, %s1810_s18  ;;  %s2706_s29 = scalar_lea.hbm %s2783_s7, %s1810_s18 }
 0x86d   : > { %v1591_v41 = vrot.slane %v1590_v37, 2  ;;  %s2710_s10 = scalar_lea.sflag [#allocation9], %s1601_s16  ;;  %s2153_s26 = scalar_lea.vmem %s2700_s11, 16 }
 0x86e   : > { %v1583_v36 = vrot.slane %v1582_v40, 1  ;;  %p2154_p0 = scmp.ne.s32.totalorder %s2700_s11, %s2153_s26  ;;  %s2271_s12 = smov [#allocation8]  }
 0x86f   : > { %v1592_v42 = vadd.f32 %v1591_v41, %v1590_v37  ;;  %s2157_s15 = sshll.u32 %s2271_s12, 4  ;;  %s2158_s15 = int_to_ptr.vmem [resolvable:$false] %s2157_s15 }
 0x870   : > { %v1584_v39 = vadd.f32 %v1583_v36, %v1582_v40  ;;  %p2155_p7 = pnand %p2154_p0, %p2803_p2  ;;  %s2159_s19 = scalar_lea.vmem %s2158_s15, 32 }
 0x871   : > { %v1593_v45 = vrot.slane %v1592_v42, 1  ;;  %p2160_p9 = scmp.lt.s32.totalorder %s2700_s11, %s2158_s15  ;;  %p2161_p10 = scmp.lt.s32.totalorder %s2159_s19, %s2153_s26 }
 0x872   : > { %1586 = vst.msk [vmem:[%s319_s9] sm:$0x1] %vm1585_vm10, %v1584_v39  ;;  %p2156_p8 = pneg %p2155_p7 }
 0x873   : > { %v1594_v38 = vadd.f32 %v1593_v45, %v1592_v42  ;;  %p2162_p1 = por %p2161_p10, %p2160_p9 }
 0x875   : > { %p2163_p4 = pnand %p2162_p1, %p2156_p8 }
 0x877   : > { %2166 = shalt.err (!%p2163_p4)
}
 0x878   : > { %s2167_s16 = scalar_lea.hbm %s2698_s17, 16  ;;  %s2171_s8 = scalar_lea.hbm %s2782_s6, 128 }
 0x879   : > { %p2168_p11 = scmp.ne.s32.totalorder %s2698_s17, %s2167_s16  ;;  %p2172_p13 = scmp.lt.s32.totalorder %s2698_s17, %s2782_s6 }
 0x87a   : > { %p2173_p3 = scmp.lt.s32.totalorder %s2171_s8, %s2167_s16 }
 0x87b   : > { %p2169_p5 = pnand %p2168_p11, %p2803_p2 }
 0x87c   : > { %p2174_p12 = por %p2173_p3, %p2172_p13 }
 0x87d   : > { %p2170_p6 = pneg %p2169_p5 }
 0x87f   : > { %p2175_p0 = pnand %p2174_p12, %p2170_p6 }
 0x881   : > { %2178 = shalt.err (!%p2175_p0)
}
 0x882   : > { %1966 = dma.vmem_to_hbm [thread:$0]  (%p2803_p2), %s2700_s11, 16, %s2698_s17, %s2710_s10   ;;  %1595 = vst.msk [vmem:[%s325_s22] sm:$0x1] %vm1585_vm10, %v1594_v38 }
 0x883   : > { %s2179_s26 = scalar_lea.vmem %s2708_s20, 16  ;;  %s2272_s12 = smov [#allocation10]  }
 0x884   : > { %p2180_p7 = scmp.ne.s32.totalorder %s2708_s20, %s2179_s26  ;;  %s2183_s15 = sshll.u32 %s2272_s12, 4  ;;  %s2184_s15 = int_to_ptr.vmem [resolvable:$false] %s2183_s15 }
 0x885   : > { %s2185_s19 = scalar_lea.vmem %s2184_s15, 32  ;;  %p2186_p10 = scmp.lt.s32.totalorder %s2708_s20, %s2184_s15 }
 0x886   : > { %p2181_p8 = pnand %p2180_p7, %p2803_p2  ;;  %p2187_p1 = scmp.lt.s32.totalorder %s2185_s19, %s2179_s26 }
 0x888   : > { %p2182_p9 = pneg %p2181_p8  ;;  %p2188_p4 = por %p2187_p1, %p2186_p10 }
 0x88a   : > { %p2189_p11 = pnand %p2188_p4, %p2182_p9 }
 0x88c   : > { %2192 = shalt.err (!%p2189_p11)
}
 0x88d   : > { %s2193_s21 = scalar_lea.hbm %s2706_s29, 16  ;;  %s2197_s17 = scalar_lea.hbm %s2783_s7, 128 }
 0x88e   : > { %p2194_p5 = scmp.ne.s32.totalorder %s2706_s29, %s2193_s21  ;;  %p2198_p3 = scmp.lt.s32.totalorder %s2706_s29, %s2783_s7 }
 0x88f   : > { %p2199_p12 = scmp.lt.s32.totalorder %s2197_s17, %s2193_s21 }
 0x890   : > { %p2195_p6 = pnand %p2194_p5, %p2803_p2 }
 0x891   : > { %p2200_p0 = por %p2199_p12, %p2198_p3 }
 0x892   : > { %p2196_p13 = pneg %p2195_p6 }
 0x894   : > { %p2201_p7 = pnand %p2200_p0, %p2196_p13 }
 0x896   : > { %2204 = shalt.err (!%p2201_p7)
}
 0x897   : > { %1967 = dma.vmem_to_hbm [thread:$0]  (%p2803_p2), %s2708_s20, 16, %s2706_s29, %s2710_s10  }
 0x898 PF: > { %p1992_p8 = scmp.ge.s32.totalorder %s2251_s27, 2  ;;  %s1656_s9 = sand.u32 1, %s2239_s24  }
 0x899   : > { %p2804_p9 = scmp.ne.s32.totalorder %s2795_s14, 0  ;;  %s1657_s8 = scalar_lea.sflag [#allocation4], %s1656_s9 }
 0x89b   : > { %p1980_p10 = pnand %p1992_p8, %p2804_p9 }
 0x89d   : > { %p1981_p1 = pneg %p1980_p10 }
 0x89f   : > { %2230 = dma.done.wait (%p1981_p1), %s1657_s8, 32  }
 0x8a0   : > { %2232 = vsyncadd (%p1981_p1), %s1657_s8, 4294967264  ;;  %s2805_s28 = sadd.s32 4294967294, %s2251_s27  }
 0x8a1   : > { %s1665_s23 = sand.u32 1, %s2805_s28  }
 0x8a2   : > { %s1666_s13 = scalar_lea.sflag [#allocation9], %s1665_s23 }
 0x8a3   : > { %2234 = dma.done.wait (%p1981_p1), %s1666_s13, 32  }
 0x8a4   : > { %2236 = vsyncadd (%p1981_p1), %s1666_s13, 4294967264  ;;  %s2806_s20 = sld [smem:[#allocation15_spill]]  ;;  %p25_p2 = scmp.ge.s32.totalorder %s2338_s30, 10  }
 0x8a5   : > { %s2807_s26 = sld [smem:[#allocation16_spill]]  ;;  %s2808_s24 = smov %s2243_s25 }
 0x8a6   : > { %s2810_s27 = smov %s2338_s30  ;;  %27 = sbr.rel (!%p25_p2) target bundleno = 8 (0x8), region = 121 }
 0x8aa   : > { %s2809_s25 = smov %s2806_s20 }
 0x8ab   :  { %1678 = vsyncpa [#allocation3], 1 }
 0x8ac   :  { %1680 = vsyncpa [#allocation3 + $0x1], 1 }
 0x8ad   :  { %1681 = vsyncpa [#allocation6], 1 }
 0x8ae   :  { %1682 = vsyncpa [#allocation4], 1 }
 0x8af   :  { %1684 = vsyncpa [#allocation4 + $0x1], 1 }
 0x8b0   :  { %1685 = vsyncpa [#allocation9], 1 }
 0x8b1   :  { %1687 = vsyncpa [#allocation9 + $0x1], 1 }

</bundles_post_ra>
